<compile_context>
chip_gen: v7x
topology: tpu7x:2x2x1
jax: 0.10.0
libtpu: 0.0.40
codegen_flags: <defaults>
</compile_context>

<pallas_src>
import jax
import jax.numpy as jnp
from jax.experimental import pallas as pl
from jax.experimental.pallas import tpu as pltpu


def _round_up(x, m):
    return ((x + m - 1) // m) * m


def _chip_info():
    """(physical VMEM bytes, has-two-TensorCores) for the local TPU."""
    vmem = None
    try:
        vmem = int(pltpu.get_tpu_info().vmem_capacity_bytes)
    except Exception:
        vmem = None
    kind = ""
    try:
        kind = jax.devices()[0].device_kind.lower()
    except Exception:
        kind = ""
    is_v7 = "v7" in kind
    if vmem is None:
        vmem = 64 * 1024 * 1024 if is_v7 else 128 * 1024 * 1024
    two_tc = is_v7 or vmem <= 64 * 1024 * 1024
    return vmem, two_tc


def _vmem_bytes(tm, d):
    io_tiles = 4 * tm * d * 4   # x + out row tiles, double-buffered by the pipeline
    weights = 4 * d * d * 4     # w1s (D,2D) + w2 (D,D) + w3 (D,D), single VMEM copy
    biases = 8 * (_round_up(2 * d, 128) + 2 * _round_up(d, 128)) * 4
    return io_tiles + weights + biases


def ff_kernel(x_ref, w1s_ref, b1s_ref, w2_ref, b2_ref, w3_ref, b3_ref, o_ref):
    d = o_ref.shape[-1]
    x = x_ref[...]                                                 # (tm, D)

    # Fused layer1 + shortcut: one (tm, D) x (D, 2D) matmul instead of two.
    h1s = jnp.dot(x, w1s_ref[...],
                  preferred_element_type=jnp.float32) + b1s_ref[...]
    h = jnp.maximum(h1s[:, :d], 0.0)
    shortcut = h1s[:, d:]

    h = jnp.maximum(jnp.dot(h, w2_ref[...],
                            preferred_element_type=jnp.float32) + b2_ref[...], 0.0)
    h = jnp.maximum(jnp.dot(h, w3_ref[...],
                            preferred_element_type=jnp.float32) + b3_ref[...], 0.0)
    o_ref[...] = (h + shortcut).astype(o_ref.dtype)


def _ff_xla(x2, params):
    """Plain-XLA fallback (used only when weights cannot stay VMEM-resident)."""
    d = x2.shape[-1]
    h1s = jnp.dot(x2, params["w1sT"]) + params["b1s"]
    h = jax.nn.relu(h1s[:, :d])
    sc = h1s[:, d:]
    h = jax.nn.relu(jnp.dot(h, params["w2T"]) + params["b2"])
    h = jax.nn.relu(jnp.dot(h, params["w3T"]) + params["b3"])
    return h + sc


def ff_forward(x, params):
    """x: [..., D] float32; params from ff_init_params (fused, pre-transposed)."""
    *lead, d = x.shape
    x2 = x.reshape(-1, d)
    n = x2.shape[0]

    vmem_cap, two_tc = _chip_info()
    budget = max(int(0.75 * vmem_cap), 32 * 1024 * 1024)

    # ---- large-D guard: weights must fit VMEM whole for this kernel --------
    weight_bytes = 4 * d * d * 4
    if weight_bytes > int(0.6 * budget):
        # TODO(synk): K/N-tiled weight-streaming Pallas path for very large D;
        # fall back to XLA so we never blow the VMEM limit / fail to compile.
        out = _ff_xla(x2, params)
        return out.reshape(*lead, d)

    # ---- row tile: ~2 MiB input blocks, clamped to budget and row count ----
    target_rows = max(1024, (2 << 20) // (4 * d))
    tm = min(_round_up(n, 8), _round_up(target_rows, 8))
    tm = max(8, (tm // 8) * 8)
    while tm > 256 and _vmem_bytes(tm, d) > budget:
        tm = max(256, ((tm // 2) // 8) * 8)
    if n >= 16:
        half = _round_up(pl.cdiv(n, 2), 8)
        if two_tc:
            tm = min(tm, half)                  # give both v7x TensorCores work
        elif half * d * 4 >= (1 << 20):         # single TC: only if still DMA-efficient
            tm = min(tm, half)

    n_pad = _round_up(n, tm)
    if n_pad != n:
        x2 = jnp.pad(x2, ((0, n_pad - n), (0, 0)))
    grid = (n_pad // tm,)

    row_spec = pl.BlockSpec((tm, d), lambda i: (i, 0))
    const_spec = pl.BlockSpec(memory_space=pltpu.MemorySpace.VMEM)

    vmem_limit = int(min(max(2 * _vmem_bytes(tm, d), 32 * 1024 * 1024),
                         vmem_cap - 8 * 1024 * 1024))

    out = pl.pallas_call(
        ff_kernel,
        out_shape=jax.ShapeDtypeStruct((n_pad, d), x.dtype),
        grid=grid,
        in_specs=[row_spec] + [const_spec] * 6,
        out_specs=pl.BlockSpec((tm, d), lambda i: (i, 0)),
        compiler_params=pltpu.CompilerParams(
            dimension_semantics=("parallel",),
            vmem_limit_bytes=vmem_limit),
    )(x2, params["w1sT"], params["b1s"], params["w2T"], params["b2"],
      params["w3T"], params["b3"])

    out = out[:n]
    return out.reshape(*lead, d)


def ff_init_params(key, input_dim, dtype=jnp.float32):
    """PyTorch nn.Linear default init; weights stored pre-transposed [in, out].

    Layer 1 and the shortcut are fused once here: w1sT = [w1T | wsT] (D, 2D),
    b1s = [b1 | bs] (1, 2D).  Unfused copies are kept for the reference.
    """
    bound = 1.0 / (input_dim ** 0.5)

    def linear_init(k):
        kw, kb = jax.random.split(k)
        w = jax.random.uniform(kw, (input_dim, input_dim), dtype, -bound, bound)
        b = jax.random.uniform(kb, (1, input_dim), dtype, -bound, bound)
        return w.T, b  # pre-transposed: [in, out]

    k1, k2, k3, ks = jax.random.split(key, 4)
    w1T, b1 = linear_init(k1)
    w2T, b2 = linear_init(k2)
    w3T, b3 = linear_init(k3)
    wsT, bs = linear_init(ks)
    return {
        "w1sT": jnp.concatenate([w1T, wsT], axis=1),
        "b1s": jnp.concatenate([b1, bs], axis=1),
        "w2T": w2T, "b2": b2, "w3T": w3T, "b3": b3,
        # unfused copies (kept for the pure-JAX reference)
        "w1T": w1T, "b1": b1, "wsT": wsT, "bs": bs,
    }


def ff_reference(x, params):
    hp = jax.lax.Precision.HIGHEST

    def linear(v, wT, b):
        return jnp.dot(v, wT, precision=hp) + b

    h = jax.nn.relu(linear(x, params["w1T"], params["b1"]))
    h = jax.nn.relu(linear(h, params["w2T"], params["b2"]))
    h = jax.nn.relu(linear(h, params["w3T"], params["b3"]))
    return h + linear(x, params["wsT"], params["bs"])


if __name__ == "__main__":
    input_dim = 32
    lead_shape = (4, 75)  # 300 rows total — deliberately not a tile multiple

    key = jax.random.PRNGKey(0)
    k_params, k_x = jax.random.split(key)
    params = ff_init_params(k_params, input_dim)
    x = jax.random.normal(k_x, lead_shape + (input_dim,), dtype=jnp.float32)

    out = ff_forward(x, params)
    jax.block_until_ready(out)

    ref = ff_reference(x, params)
    assert out.shape == ref.shape, "shape mismatch vs reference"
    assert jnp.allclose(out, ref, atol=1e-4, rtol=1e-4), "mismatch vs reference"

    print("KERNEL_OK")
</pallas_src>

<mosaic_0001>
module attributes {stable_mosaic.version = 11 : i64} {
  func.func @ff_kernel(%arg0: i32, %arg1: memref<304x32xf32, #tpu.memory_space<vmem>>, %arg2: memref<32x64xf32, #tpu.memory_space<vmem>>, %arg3: memref<1x64xf32, #tpu.memory_space<vmem>>, %arg4: memref<32x32xf32, #tpu.memory_space<vmem>>, %arg5: memref<1x32xf32, #tpu.memory_space<vmem>>, %arg6: memref<32x32xf32, #tpu.memory_space<vmem>>, %arg7: memref<1x32xf32, #tpu.memory_space<vmem>>, %arg8: memref<304x32xf32, #tpu.memory_space<vmem>>) attributes {dimension_semantics = [#tpu.dimension_semantics<parallel>], iteration_bounds = array<i64: 1>, scalar_prefetch = 0 : i64, scratch_operands = 0 : i64, tpu.core_type = #tpu.core_type<tc>, window_params = [{transform_indices = @transform_0, window_bounds = array<i64: 304, 32>}, {pipeline_mode = #tpu.pipeline_mode<synchronous>, transform_indices = @transform_1, window_bounds = array<i64: 32, 64>}, {pipeline_mode = #tpu.pipeline_mode<synchronous>, transform_indices = @transform_2, window_bounds = array<i64: 1, 64>}, {pipeline_mode = #tpu.pipeline_mode<synchronous>, transform_indices = @transform_3, window_bounds = array<i64: 32, 32>}, {pipeline_mode = #tpu.pipeline_mode<synchronous>, transform_indices = @transform_4, window_bounds = array<i64: 1, 32>}, {pipeline_mode = #tpu.pipeline_mode<synchronous>, transform_indices = @transform_5, window_bounds = array<i64: 32, 32>}, {pipeline_mode = #tpu.pipeline_mode<synchronous>, transform_indices = @transform_6, window_bounds = array<i64: 1, 32>}, {transform_indices = @transform_7, window_bounds = array<i64: 304, 32>}]} {
    %c0 = arith.constant 0 : index
    %c0_0 = arith.constant 0 : index
    %0 = vector.load %arg1[%c0, %c0_0] : memref<304x32xf32, #tpu.memory_space<vmem>>, vector<304x32xf32>
    %c0_1 = arith.constant 0 : index
    %c0_2 = arith.constant 0 : index
    %1 = vector.load %arg2[%c0_1, %c0_2] : memref<32x64xf32, #tpu.memory_space<vmem>>, vector<32x64xf32>
    %cst = arith.constant dense<0.000000e+00> : vector<304x64xf32>
    %2 = tpu.matmul %0, %1, %cst {dimension_numbers = #tpu.dot_dimension_numbers<[1], [0], [0], [1], [0, 0, 1, 1], [], []>} : vector<304x32xf32>, vector<32x64xf32>, vector<304x64xf32> -> vector<304x64xf32>
    %c0_3 = arith.constant 0 : index
    %c0_4 = arith.constant 0 : index
    %3 = vector.load %arg3[%c0_3, %c0_4] : memref<1x64xf32, #tpu.memory_space<vmem>>, vector<1x64xf32>
    %4 = vector.broadcast %3 : vector<1x64xf32> to vector<304x64xf32>
    %5 = arith.addf %2, %4 : vector<304x64xf32>
    %6 = vector.extract_strided_slice %5 {offsets = [0, 0], sizes = [304, 32], strides = [1, 1]} : vector<304x64xf32> to vector<304x32xf32>
    %cst_5 = arith.constant 0.000000e+00 : f32
    %7 = vector.broadcast %cst_5 : f32 to vector<304x32xf32>
    %8 = arith.maximumf %6, %7 : vector<304x32xf32>
    %9 = vector.extract_strided_slice %5 {offsets = [0, 32], sizes = [304, 32], strides = [1, 1]} : vector<304x64xf32> to vector<304x32xf32>
    %c0_6 = arith.constant 0 : index
    %c0_7 = arith.constant 0 : index
    %10 = vector.load %arg4[%c0_6, %c0_7] : memref<32x32xf32, #tpu.memory_space<vmem>>, vector<32x32xf32>
    %cst_8 = arith.constant dense<0.000000e+00> : vector<304x32xf32>
    %11 = tpu.matmul %8, %10, %cst_8 {dimension_numbers = #tpu.dot_dimension_numbers<[1], [0], [0], [1], [0, 0, 1, 1], [], []>} : vector<304x32xf32>, vector<32x32xf32>, vector<304x32xf32> -> vector<304x32xf32>
    %c0_9 = arith.constant 0 : index
    %c0_10 = arith.constant 0 : index
    %12 = vector.load %arg5[%c0_9, %c0_10] : memref<1x32xf32, #tpu.memory_space<vmem>>, vector<1x32xf32>
    %13 = vector.broadcast %12 : vector<1x32xf32> to vector<304x32xf32>
    %14 = arith.addf %11, %13 : vector<304x32xf32>
    %cst_11 = arith.constant 0.000000e+00 : f32
    %15 = vector.broadcast %cst_11 : f32 to vector<304x32xf32>
    %16 = arith.maximumf %14, %15 : vector<304x32xf32>
    %c0_12 = arith.constant 0 : index
    %c0_13 = arith.constant 0 : index
    %17 = vector.load %arg6[%c0_12, %c0_13] : memref<32x32xf32, #tpu.memory_space<vmem>>, vector<32x32xf32>
    %cst_14 = arith.constant dense<0.000000e+00> : vector<304x32xf32>
    %18 = tpu.matmul %16, %17, %cst_14 {dimension_numbers = #tpu.dot_dimension_numbers<[1], [0], [0], [1], [0, 0, 1, 1], [], []>} : vector<304x32xf32>, vector<32x32xf32>, vector<304x32xf32> -> vector<304x32xf32>
    %c0_15 = arith.constant 0 : index
    %c0_16 = arith.constant 0 : index
    %19 = vector.load %arg7[%c0_15, %c0_16] : memref<1x32xf32, #tpu.memory_space<vmem>>, vector<1x32xf32>
    %20 = vector.broadcast %19 : vector<1x32xf32> to vector<304x32xf32>
    %21 = arith.addf %18, %20 : vector<304x32xf32>
    %cst_17 = arith.constant 0.000000e+00 : f32
    %22 = vector.broadcast %cst_17 : f32 to vector<304x32xf32>
    %23 = arith.maximumf %21, %22 : vector<304x32xf32>
    %24 = arith.addf %23, %9 : vector<304x32xf32>
    %c0_18 = arith.constant 0 : index
    %c0_19 = arith.constant 0 : index
    %25 = vector.load %arg8[%c0_18, %c0_19] : memref<304x32xf32, #tpu.memory_space<vmem>>, vector<304x32xf32>
    tpu.vector_store %arg8[%c0_18, %c0_19], %24 {strides = array<i32>} : memref<304x32xf32, #tpu.memory_space<vmem>>, vector<304x32xf32>,
    return
  }
  func.func @transform_0(%arg0: i32) -> (i32, i32) {
    %c0_i32 = arith.constant 0 : i32
    %c0_i32_0 = arith.constant 0 : i32
    return %arg0, %c0_i32 : i32, i32
  }
  func.func @transform_1(%arg0: i32) -> (i32, i32) {
    %c0_i32 = arith.constant 0 : i32
    %c0_i32_0 = arith.constant 0 : i32
    %c0_i32_1 = arith.constant 0 : i32
    return %c0_i32, %c0_i32_0 : i32, i32
  }
  func.func @transform_2(%arg0: i32) -> (i32, i32) {
    %c0_i32 = arith.constant 0 : i32
    %c0_i32_0 = arith.constant 0 : i32
    %c0_i32_1 = arith.constant 0 : i32
    return %c0_i32, %c0_i32_0 : i32, i32
  }
  func.func @transform_3(%arg0: i32) -> (i32, i32) {
    %c0_i32 = arith.constant 0 : i32
    %c0_i32_0 = arith.constant 0 : i32
    %c0_i32_1 = arith.constant 0 : i32
    return %c0_i32, %c0_i32_0 : i32, i32
  }
  func.func @transform_4(%arg0: i32) -> (i32, i32) {
    %c0_i32 = arith.constant 0 : i32
    %c0_i32_0 = arith.constant 0 : i32
    %c0_i32_1 = arith.constant 0 : i32
    return %c0_i32, %c0_i32_0 : i32, i32
  }
  func.func @transform_5(%arg0: i32) -> (i32, i32) {
    %c0_i32 = arith.constant 0 : i32
    %c0_i32_0 = arith.constant 0 : i32
    %c0_i32_1 = arith.constant 0 : i32
    return %c0_i32, %c0_i32_0 : i32, i32
  }
  func.func @transform_6(%arg0: i32) -> (i32, i32) {
    %c0_i32 = arith.constant 0 : i32
    %c0_i32_0 = arith.constant 0 : i32
    %c0_i32_1 = arith.constant 0 : i32
    return %c0_i32, %c0_i32_0 : i32, i32
  }
  func.func @transform_7(%arg0: i32) -> (i32, i32) {
    %c0_i32 = arith.constant 0 : i32
    %c0_i32_0 = arith.constant 0 : i32
    return %arg0, %c0_i32 : i32, i32
  }
}

</mosaic_0001>

<bundles_post_ra>
// kernel: tpu_custom_call.1
= control target key start
LH: loop header
LB: loop body
LE: loop exit
PB: predicated region body
PF: predicated region fallthrough
CT: control target
= control target key end

     0   :  { %vm75_vm0 = vcmask 261120   ;;  %s2797_s1 = inlined_call_operand.vmem [shape: f32[32,64], index: 1, kind: input, shape index: {}]   ;;  %s2798_s0 = inlined_call_operand.vmem [shape: f32[304,32], index: 0, kind: input, shape index: {}]   ;;  %s2799_s3 = inlined_call_operand.vmem [shape: f32[32,32], index: 3, kind: input, shape index: {}]   ;;  %s2800_s2 = inlined_call_operand.vmem [shape: f32[1,64], index: 2, kind: input, shape index: {}]   ;;  %s2801_s5 = inlined_call_operand.vmem [shape: f32[32,32], index: 5, kind: input, shape index: {}]   ;;  %s2802_s4 = inlined_call_operand.vmem [shape: f32[1,32], index: 4, kind: input, shape index: {}]   ;;  %s2803_s6 = inlined_call_operand.vmem [shape: f32[1,32], index: 6, kind: input, shape index: {}]   ;;  %s2804_s7 = inlined_call_operand.vmem [shape: f32[304,32], index: 7, kind: output, shape index: {}]  }
   0x1   :  { %v64_v0 = vld [vmem:[%s2797_s1] sm:$0xff]  ;;  %v65_v1 = vld [vmem:[%s2797_s1 + $0x8] sm:$0xff]  ;;  %v66_v2 = vld [vmem:[%s2797_s1 + $0x10] sm:$0xff] }
   0x2   :  { %v1989_v3 = vpack.c.bf16 %v65_v1, %v64_v0  ;;  %v67_v4 = vld [vmem:[%s2797_s1 + $0x18] sm:$0xff]  ;;  %v26_v5 = vld [vmem:[%s2798_s0] sm:$0xff]  ;;  %v27_v8 = vld [vmem:[%s2798_s0 + $0x8] sm:$0xff] }
   0x3   :  { %v46_v6 = vld [vmem:[%s2798_s0 + $0xa0] sm:$0xff]  ;;  %v1993_v7 = vpack.c.bf16 %v67_v4, %v66_v2  ;;  %1802 = vmatprep.mubr.msk.f32.mxu0 %vm75_vm0, %v26_v5  ;;  %v47_v9 = vld [vmem:[%s2798_s0 + $0xa8] sm:$0xff]  ;;  %v28_v10 = vld [vmem:[%s2798_s0 + $0x10] sm:$0xff] }
   0x4   :  { %1832 = vmatprep.mubr.msk.f32.mxu1 %vm75_vm0, %v46_v6  ;;  %1990 = vmatprep.subr.bf16.mxu0 %v1989_v3  ;;  %v48_v11 = vld [vmem:[%s2798_s0 + $0xb0] sm:$0xff]  ;;  %v29_v12 = vld [vmem:[%s2798_s0 + $0x18] sm:$0xff]  ;;  %v30_v14 = vld [vmem:[%s2798_s0 + $0x20] sm:$0xff] }
   0x5   :  { %2013 = vmatprep.subr.bf16.mxu1 %v1989_v3  ;;  %1992 = vmatpush3.bf16.msra.mxu0 %v1989_v3  ;;  %v49_v13 = vld [vmem:[%s2798_s0 + $0xb8] sm:$0xff]  ;;  %v50_v15 = vld [vmem:[%s2798_s0 + $0xc0] sm:$0xff]  ;;  %v484_v17 = vld [vmem:[%s2799_s3 + $0x8] sm:$0xff] }
   0x6   :  { %2015 = vmatpush3.bf16.msra.mxu1 %v1989_v3  ;;  %1994 = vmatprep.subr.bf16.mxu0 %v1993_v7  ;;  %v483_v16 = vld [vmem:[%s2799_s3] sm:$0xff]  ;;  %v485_v18 = vld [vmem:[%s2799_s3 + $0x10] sm:$0xff]  ;;  %v486_v20 = vld [vmem:[%s2799_s3 + $0x18] sm:$0xff]  ;;  %s2018_s3 = smov 96  }
   0x7   :  { %2014 = vmatprep.subr.bf16.mxu1 %v1993_v7  ;;  %v1997_v19 = vpack.c.bf16 %v484_v17, %v483_v16  ;;  %v31_v21 = vld [vmem:[%s2798_s0 + $0x28] sm:$0xff]  ;;  %v32_v23 = vld [vmem:[%s2798_s0 + $0x30] sm:$0xff]  ;;  %v2001_v25 = vpack.c.bf16 %v486_v20, %v485_v18  ;;  %v33_v26 = vld [vmem:[%s2798_s0 + $0x38] sm:$0xff] }
   0x8   :  { %v51_v22 = vld [vmem:[%s2798_s0 + $0xc8] sm:$0xff]  ;;  %v52_v24 = vld [vmem:[%s2798_s0 + $0xd0] sm:$0xff]  ;;  %v53_v27 = vld [vmem:[%s2798_s0 + $0xd8] sm:$0xff] }
   0x9   :  { %1996 = vmatpush3.bf16.msra.mxu0 %v1993_v7  ;;  %v34_v28 = vld [vmem:[%s2798_s0 + $0x40] sm:$0xff]  ;;  %v35_v30 = vld [vmem:[%s2798_s0 + $0x48] sm:$0xff]  ;;  %v36_v32 = vld [vmem:[%s2798_s0 + $0x50] sm:$0xff] }
   0xa   :  { %2016 = vmatpush3.bf16.msra.mxu1 %v1993_v7  ;;  %v54_v29 = vld [vmem:[%s2798_s0 + $0xe0] sm:$0xff]  ;;  %v55_v31 = vld [vmem:[%s2798_s0 + $0xe8] sm:$0xff]  ;;  %v56_v33 = vld [vmem:[%s2798_s0 + $0xf0] sm:$0xff] }
   0xb   :  { %1998 = vmatprep.subr.bf16.mxu1 %v1997_v19  ;;  %v37_v34 = vld [vmem:[%s2798_s0 + $0x58] sm:$0xff]  ;;  %v38_v36 = vld [vmem:[%s2798_s0 + $0x60] sm:$0xff]  ;;  %v39_v38 = vld [vmem:[%s2798_s0 + $0x68] sm:$0xff] }
   0xc   :  { %1803 = vmatmul.mubr.msk.f32.vlgmr.msra.gmra.mrb[0].mxu0 %vm75_vm0, %v27_v8  ;;  %v57_v35 = vld [vmem:[%s2798_s0 + $0xf8] sm:$0xff]  ;;  %v58_v37 = vld [vmem:[%s2798_s0 + $0x100] sm:$0xff]  ;;  %v59_v39 = vld [vmem:[%s2798_s0 + $0x108] sm:$0xff] }
   0xd   :  { %1833 = vmatmul.mubr.msk.f32.vlgmr.msra.gmra.mrb[0].mxu1 %vm75_vm0, %v47_v9  ;;  %1805 = vmatprep.mubr.msk.f32.mxu0 %vm75_vm0, %v28_v10  ;;  %v40_v40 = vld [vmem:[%s2798_s0 + $0x70] sm:$0xff]  ;;  %v41_v42 = vld [vmem:[%s2798_s0 + $0x78] sm:$0xff]  ;;  %v42_v44 = vld [vmem:[%s2798_s0 + $0x80] sm:$0xff] }
   0xe   :  { %1835 = vmatprep.mubr.msk.f32.mxu1 %vm75_vm0, %v48_v11  ;;  %2000 = vmatpush3.bf16.msra.mxu1 %v1997_v19  ;;  %v60_v41 = vld [vmem:[%s2798_s0 + $0x110] sm:$0xff]  ;;  %v61_v43 = vld [vmem:[%s2798_s0 + $0x118] sm:$0xff]  ;;  %v62_v45 = vld [vmem:[%s2798_s0 + $0x120] sm:$0xff] }
   0xf   :  { %2002 = vmatprep.subr.bf16.mxu1 %v2001_v25  ;;  %v43_v46 = vld [vmem:[%s2798_s0 + $0x88] sm:$0xff]  ;;  %v44_v48 = vld [vmem:[%s2798_s0 + $0x90] sm:$0xff]  ;;  %v45_v49 = vld [vmem:[%s2798_s0 + $0x98] sm:$0xff] }
  0x10   :  { %1806 = vmatmul.mubr.msk.f32.gmra.mrb[2].mxu0 %vm75_vm0, %v29_v12  ;;  %v63_v47 = vld [vmem:[%s2798_s0 + $0x128] sm:$0xff]  ;;  %v2238_v50 = vld [vmem:[%s2800_s2] ss:$0 sm:$0xff] }
  0x11   :  { %1836 = vmatmul.mubr.msk.f32.gmra.mrb[2].mxu1 %vm75_vm0, %v49_v13  ;;  %1808 = vmatprep.mubr.msk.f32.mxu0 %vm75_vm0, %v30_v14 }
  0x12   :  { %1838 = vmatprep.mubr.msk.f32.mxu1 %vm75_vm0, %v50_v15  ;;  %2004 = vmatpush3.bf16.msra.mxu1 %v2001_v25 }
  0x14   :  { %1809 = vmatmul.mubr.msk.f32.gmra.mrb[4].mxu0 %vm75_vm0, %v31_v21 }
  0x15   :  { %1839 = vmatmul.mubr.msk.f32.gmra.mrb[4].mxu1 %vm75_vm0, %v51_v22  ;;  %1811 = vmatprep.mubr.msk.f32.mxu0 %vm75_vm0, %v32_v23 }
  0x16   :  { %1841 = vmatprep.mubr.msk.f32.mxu1 %vm75_vm0, %v52_v24 }
  0x18   :  { %1812 = vmatmul.mubr.msk.f32.gmra.mrb[6].mxu0 %vm75_vm0, %v33_v26 }
  0x19   :  { %1842 = vmatmul.mubr.msk.f32.gmra.mrb[6].mxu1 %vm75_vm0, %v53_v27  ;;  %1814 = vmatprep.mubr.msk.f32.mxu0 %vm75_vm0, %v34_v28 }
  0x1a   :  { %1844 = vmatprep.mubr.msk.f32.mxu1 %vm75_vm0, %v54_v29 }
  0x1c   :  { %1815 = vmatmul.mubr.msk.f32.gmra.mrb[8].mxu0 %vm75_vm0, %v35_v30 }
  0x1d   :  { %1845 = vmatmul.mubr.msk.f32.gmra.mrb[8].mxu1 %vm75_vm0, %v55_v31  ;;  %1817 = vmatprep.mubr.msk.f32.mxu0 %vm75_vm0, %v36_v32 }
  0x1e   :  { %1847 = vmatprep.mubr.msk.f32.mxu1 %vm75_vm0, %v56_v33 }
  0x20   :  { %1818 = vmatmul.mubr.msk.f32.gmra.mrb[10].mxu0 %vm75_vm0, %v37_v34 }
  0x21   :  { %1848 = vmatmul.mubr.msk.f32.gmra.mrb[10].mxu1 %vm75_vm0, %v57_v35  ;;  %1820 = vmatprep.mubr.msk.f32.mxu0 %vm75_vm0, %v38_v36 }
  0x22   :  { %1850 = vmatprep.mubr.msk.f32.mxu1 %vm75_vm0, %v58_v37 }
  0x24   :  { %1821 = vmatmul.mubr.msk.f32.gmra.mrb[12].mxu0 %vm75_vm0, %v39_v38 }
  0x25   :  { %1851 = vmatmul.mubr.msk.f32.gmra.mrb[12].mxu1 %vm75_vm0, %v59_v39  ;;  %1823 = vmatprep.mubr.msk.f32.mxu0 %vm75_vm0, %v40_v40 }
  0x26   :  { %1853 = vmatprep.mubr.msk.f32.mxu1 %vm75_vm0, %v60_v41 }
  0x28   :  { %1824 = vmatmul.mubr.msk.f32.gmra.mrb[14].mxu0 %vm75_vm0, %v41_v42 }
  0x29   :  { %1854 = vmatmul.mubr.msk.f32.gmra.mrb[14].mxu1 %vm75_vm0, %v61_v43  ;;  %1826 = vmatprep.mubr.msk.f32.mxu0 %vm75_vm0, %v42_v44 }
  0x2a   :  { %1856 = vmatprep.mubr.msk.f32.mxu1 %vm75_vm0, %v62_v45 }
  0x2c   :  { %1827 = vmatmul.mubr.msk.f32.gmra.mrb[16].mxu0 %vm75_vm0, %v43_v46 }
  0x2d   :  { %1857 = vmatmul.mubr.msk.f32.gmra.mrb[16].mxu1 %vm75_vm0, %v63_v47  ;;  %1829 = vmatprep.mubr.msk.f32.mxu0 %vm75_vm0, %v44_v48 }
  0x30   :  { %1830 = vmatmul.mubr.msk.f32.gmra.mrb[18].mxu0 %vm75_vm0, %v45_v49 }
  0xdf   :  { %v1804_v51 = vpop.f32.mrb[0].mxu0 }
  0xe0   :  { %v1834_v52 = vpop.f32.mrb[0].mxu1  ;;  %v262_v53 = vadd.f32 %v1804_v51, %v2238_v50  ;;  %v256_v55 = vpop.f32.mrb[1].mxu0 }
  0xe1   :  { %v2242_v54 = vadd.f32 %v1834_v52, %v2238_v50  ;;  %v356_v56 = vpop.f32.mrb[1].mxu1  ;;  %v257_v57 = vadd.f32 %v2238_v50, %v256_v55 }
  0xe2   :  { %1359 = vrot.lane.b32.xlu0 %v262_v53, %s2018_s3  ;;  %v446_v0 = vmax.f32 %v262_v53, 0.0  ;;  %v2252_v2 = vadd.f32 %v2238_v50, %v356_v56 }
  0xe3   :  { %1399 = vrot.lane.b32.xlu1 %v2242_v54, %s2018_s3  ;;  %v445_v58 = vmax.f32 %v257_v57, 0.0  ;;  %v1807_v59 = vpop.f32.mrb[2].mxu0 }
  0xe4   :  { %v1837_v60 = vpop.f32.mrb[2].mxu1  ;;  %v272_v61 = vadd.f32 %v1807_v59, %v2238_v50  ;;  %v266_v62 = vpop.f32.mrb[3].mxu0 }
  0xe5   :  { %v366_v63 = vpop.f32.mrb[3].mxu1  ;;  %v267_v1 = vadd.f32 %v2238_v50, %v266_v62  ;;  %1867 = vmatprep.mubr.msk.f32.mxu1 %vm75_vm0, %v445_v58  ;;  %v2257_v3 = vadd.f32 %v1837_v60, %v2238_v50 }
  0xe6   :  { %1357 = vrot.lane.b32.xlu0 %v257_v57, %s2018_s3  ;;  %1868 = vmatmul.mubr.msk.f32.vlgmr.msra.gmra.mrb[18].mxu1 %vm75_vm0, %v446_v0  ;;  %v448_v9 = vmax.f32 %v272_v61, 0.0  ;;  %v2268_v12 = vadd.f32 %v2238_v50, %v366_v63 }
  0xe7   :  { %1363 = vrot.lane.b32.xlu1 %v272_v61, %s2018_s3  ;;  %v447_v4 = vmax.f32 %v267_v1, 0.0  ;;  %v1810_v5 = vpop.f32.mrb[4].mxu0 }
  0xe8   :  { %v1840_v6 = vpop.f32.mrb[4].mxu1  ;;  %v276_v7 = vpop.f32.mrb[5].mxu0  ;;  %v282_v10 = vadd.f32 %v1810_v5, %v2238_v50 }
  0xe9   :  { %v376_v8 = vpop.f32.mrb[5].mxu1  ;;  %v277_v11 = vadd.f32 %v2238_v50, %v276_v7  ;;  %1870 = vmatprep.mubr.msk.f32.mxu1 %vm75_vm0, %v447_v4  ;;  %v2282_v29 = vadd.f32 %v1840_v6, %v2238_v50 }
  0xea   :  { %1397 = vrot.lane.b32.xlu0 %v2252_v2, %s2018_s3  ;;  %1871 = vmatmul.mubr.msk.f32.gmra.mrb[20].mxu1 %vm75_vm0, %v448_v9  ;;  %v450_v18 = vmax.f32 %v282_v10, 0.0  ;;  %v2287_v30 = vadd.f32 %v2238_v50, %v376_v8 }
  0xeb   :  { %1403 = vrot.lane.b32.xlu1 %v2257_v3, %s2018_s3  ;;  %v449_v13 = vmax.f32 %v277_v11, 0.0  ;;  %v1813_v14 = vpop.f32.mrb[6].mxu0 }
  0xec   :  { %v1843_v15 = vpop.f32.mrb[6].mxu1  ;;  %v286_v16 = vpop.f32.mrb[7].mxu0  ;;  %v292_v19 = vadd.f32 %v1813_v14, %v2238_v50 }
  0xed   :  { %v386_v17 = vpop.f32.mrb[7].mxu1  ;;  %v287_v20 = vadd.f32 %v2238_v50, %v286_v16  ;;  %1873 = vmatprep.mubr.msk.f32.mxu1 %vm75_vm0, %v449_v13  ;;  %v2317_v47 = vadd.f32 %v1843_v15, %v2238_v50 }
  0xee   :  { %1401 = vrot.lane.b32.xlu0 %v2268_v12, %s2018_s3  ;;  %1874 = vmatmul.mubr.msk.f32.gmra.mrb[22].mxu1 %vm75_vm0, %v450_v18  ;;  %v452_v26 = vmax.f32 %v292_v19, 0.0  ;;  %v2322_v48 = vadd.f32 %v2238_v50, %v386_v17  ;;  %v465_v17 = vmax.f32 %v2252_v2, 0.0  ;;  %v466_v2 = vmax.f32 %v2242_v54, 0.0 }
  0xef   :  { %1361 = vrot.lane.b32.xlu1 %v267_v1, %s2018_s3  ;;  %v451_v21 = vmax.f32 %v287_v20, 0.0  ;;  %v1816_v22 = vpop.f32.mrb[8].mxu0 }
  0xf0   :  { %v1846_v23 = vpop.f32.mrb[8].mxu1  ;;  %v296_v24 = vpop.f32.mrb[9].mxu0  ;;  %v302_v27 = vadd.f32 %v1816_v22, %v2238_v50  ;;  %v469_v22 = vmax.f32 %v2287_v30, 0.0 }
  0xf1   :  { %v396_v25 = vpop.f32.mrb[9].mxu1  ;;  %v297_v28 = vadd.f32 %v2238_v50, %v296_v24  ;;  %1876 = vmatprep.mubr.msk.f32.mxu1 %vm75_vm0, %v451_v21  ;;  %v2359_v7 = vadd.f32 %v1846_v23, %v2238_v50  ;;  %v467_v21 = vmax.f32 %v2268_v12, 0.0  ;;  %v468_v23 = vmax.f32 %v2257_v3, 0.0 }
  0xf2   :  { %1365 = vrot.lane.b32.xlu0 %v277_v11, %s2018_s3  ;;  %1877 = vmatmul.mubr.msk.f32.gmra.mrb[24].mxu1 %vm75_vm0, %v452_v26  ;;  %v454_v36 = vmax.f32 %v302_v27, 0.0  ;;  %v397_v8 = vadd.f32 %v2238_v50, %v396_v25  ;;  %v471_v12 = vmax.f32 %v2322_v48, 0.0  ;;  %v470_v3 = vmax.f32 %v2282_v29, 0.0  ;;  %v901_v25 = vld [vmem:[%s2801_s5] sm:$0xff]  ;;  %v902_v26 = vld [vmem:[%s2801_s5 + $0x8] sm:$0xff] }
  0xf3   :  { %1367 = vrot.lane.b32.xlu1 %v282_v10, %s2018_s3  ;;  %v453_v31 = vmax.f32 %v297_v28, 0.0  ;;  %v1819_v32 = vpop.f32.mrb[10].mxu0 }
  0xf4   :  { %v2290_v33 = vpop.f32.mrb[10].mxu1  ;;  %v306_v34 = vpop.f32.mrb[11].mxu0  ;;  %v2295_v37 = vadd.f32 %v1819_v32, %v2238_v50 }
  0xf5   :  { %v2292_v35 = vpop.f32.mrb[11].mxu1  ;;  %v307_v38 = vadd.f32 %v2238_v50, %v306_v34  ;;  %1879 = vmatprep.mubr.msk.f32.mxu1 %vm75_vm0, %v453_v31  ;;  %v904_v34 = vld [vmem:[%s2801_s5 + $0x18] sm:$0xff] }
  0xf6   :  { %1405 = vrot.lane.b32.xlu0 %v2287_v30, %s2018_s3  ;;  %1880 = vmatmul.mubr.msk.f32.gmra.mrb[26].mxu1 %vm75_vm0, %v454_v36  ;;  %v456_v44 = vmax.f32 %v2295_v37, 0.0 }
  0xf7   :  { %1407 = vrot.lane.b32.xlu1 %v2282_v29, %s2018_s3  ;;  %v455_v39 = vmax.f32 %v307_v38, 0.0  ;;  %v1822_v40 = vpop.f32.mrb[12].mxu0  ;;  %v472_v29 = vmax.f32 %v2317_v47, 0.0 }
  0xf8   :  { %v2304_v41 = vpop.f32.mrb[12].mxu1  ;;  %v316_v42 = vpop.f32.mrb[13].mxu0  ;;  %v2310_v45 = vadd.f32 %v1822_v40, %v2238_v50 }
  0xf9   :  { %v2306_v43 = vpop.f32.mrb[13].mxu1  ;;  %v2313_v46 = vadd.f32 %v2238_v50, %v316_v42  ;;  %1882 = vmatprep.mubr.msk.f32.mxu1 %vm75_vm0, %v455_v39  ;;  %v422_v24 = vadd.f32 %v2304_v41, %v2238_v50 }
  0xfa   :  { %1369 = vrot.lane.b32.xlu0 %v287_v20, %s2018_s3  ;;  %1883 = vmatmul.mubr.msk.f32.gmra.mrb[28].mxu1 %vm75_vm0, %v456_v44  ;;  %v458_v56 = vmax.f32 %v2310_v45, 0.0  ;;  %v407_v20 = vadd.f32 %v2238_v50, %v2292_v35  ;;  %v417_v54 = vadd.f32 %v2238_v50, %v2306_v43  ;;  %v474_v35 = vmax.f32 %v2359_v7, 0.0  ;;  %v2467_v43 = vld [vmem:[%s2802_s4] ss:$0 sm:$0xff] }
  0xfb   :  { %1371 = vrot.lane.b32.xlu1 %v292_v19, %s2018_s3  ;;  %v457_v49 = vmax.f32 %v2313_v46, 0.0  ;;  %v1825_v51 = vpop.f32.mrb[14].mxu0  ;;  %v412_v19 = vadd.f32 %v2290_v33, %v2238_v50  ;;  %v903_v33 = vld [vmem:[%s2801_s5 + $0x10] sm:$0xff]  ;;  %v478_v39 = vmax.f32 %v422_v24, 0.0 }
  0xfc   :  { %v2326_v52 = vpop.f32.mrb[14].mxu1  ;;  %v326_v53 = vpop.f32.mrb[15].mxu0  ;;  %v2332_v57 = vadd.f32 %v1825_v51, %v2238_v50  ;;  %v475_v32 = vmax.f32 %v407_v20, 0.0  ;;  %v2009_v36 = vpack.c.bf16 %v904_v34, %v903_v33 }
  0xfd   :  { %v2328_v55 = vpop.f32.mrb[15].mxu1  ;;  %v2335_v58 = vadd.f32 %v2238_v50, %v326_v53  ;;  %1885 = vmatprep.mubr.msk.f32.mxu1 %vm75_vm0, %v457_v49  ;;  %v432_v30 = vadd.f32 %v2326_v52, %v2238_v50 }
  0xfe   :  { %1409 = vrot.lane.b32.xlu0 %v2322_v48, %s2018_s3  ;;  %1886 = vmatmul.mubr.msk.f32.gmra.mrb[30].mxu1 %vm75_vm0, %v458_v56  ;;  %v460_v1 = vmax.f32 %v2332_v57, 0.0  ;;  %v427_v31 = vadd.f32 %v2238_v50, %v2328_v55 }
  0xff   :  { %1411 = vrot.lane.b32.xlu1 %v2317_v47, %s2018_s3  ;;  %v459_v59 = vmax.f32 %v2335_v58, 0.0  ;;  %v1828_v60 = vpop.f32.mrb[16].mxu0  ;;  %v480_v41 = vmax.f32 %v432_v30, 0.0 }
 0x100   :  { %v1858_v61 = vpop.f32.mrb[16].mxu1  ;;  %v336_v62 = vpop.f32.mrb[17].mxu0  ;;  %v2349_v4 = vadd.f32 %v1828_v60, %v2238_v50 }
 0x101   :  { %v2345_v63 = vadd.f32 %v1858_v61, %v2238_v50  ;;  %v436_v0 = vpop.f32.mrb[17].mxu1  ;;  %v2352_v5 = vadd.f32 %v2238_v50, %v336_v62  ;;  %1888 = vmatprep.mubr.msk.f32.mxu1 %vm75_vm0, %v459_v59 }
 0x102   :  { %v2356_v6 = vadd.f32 %v2238_v50, %v436_v0  ;;  %1373 = vrot.lane.b32.xlu0 %v297_v28, %s2018_s3  ;;  %1889 = vmatmul.mubr.msk.f32.gmra.mrb[32].mxu1 %vm75_vm0, %v460_v1  ;;  %v462_v13 = vmax.f32 %v2349_v4, 0.0  ;;  %v473_v28 = vmax.f32 %v397_v8, 0.0 }
 0x103   :  { %1375 = vrot.lane.b32.xlu1 %v302_v27, %s2018_s3  ;;  %v461_v9 = vmax.f32 %v2352_v5, 0.0  ;;  %v1831_v10 = vpop.f32.mrb[18].mxu0  ;;  %v2005_v27 = vpack.c.bf16 %v902_v26, %v901_v25  ;;  %v482_v42 = vmax.f32 %v2345_v63, 0.0 }
 0x104   :  { %v346_v11 = vpop.f32.mrb[19].mxu0  ;;  %v2368_v14 = vadd.f32 %v1831_v10, %v2238_v50  ;;  %v481_v40 = vmax.f32 %v2356_v6, 0.0 }
 0x105   :  { %v2371_v15 = vadd.f32 %v2238_v50, %v346_v11  ;;  %1891 = vmatprep.mubr.msk.f32.mxu1 %vm75_vm0, %v461_v9  ;;  %2006 = vmatprep.subr.bf16.mxu0 %v2005_v27  ;;  %v477_v50 = vmax.f32 %v417_v54, 0.0 }
 0x106   :  { %1413 = vrot.lane.b32.xlu0 %v397_v8, %s2018_s3  ;;  %1892 = vmatmul.mubr.msk.f32.gmra.mrb[34].mxu1 %vm75_vm0, %v462_v13  ;;  %v464_v18 = vmax.f32 %v2368_v14, 0.0 }
 0x107   :  { %1415 = vrot.lane.b32.xlu1 %v2359_v7, %s2018_s3  ;;  %v463_v16 = vmax.f32 %v2371_v15, 0.0  ;;  %2008 = vmatpush3.bf16.msra.mxu0 %v2005_v27 }
 0x108   :  { %2010 = vmatprep.subr.bf16.mxu0 %v2009_v36 }
 0x109   :  { %1894 = vmatprep.mubr.msk.f32.mxu1 %vm75_vm0, %v463_v16 }
 0x10a   :  { %1377 = vrot.lane.b32.xlu0 %v307_v38, %s2018_s3  ;;  %1895 = vmatmul.mubr.msk.f32.gmra.mrb[36].mxu1 %vm75_vm0, %v464_v18  ;;  %v479_v38 = vmax.f32 %v427_v31, 0.0 }
 0x10b   :  { %1379 = vrot.lane.b32.xlu1 %v2295_v37, %s2018_s3  ;;  %1897 = vmatprep.mubr.msk.f32.mxu1 %vm75_vm0, %v465_v17  ;;  %v476_v37 = vmax.f32 %v412_v19, 0.0 }
 0x10c   :  { %2012 = vmatpush3.bf16.msra.mxu0 %v2009_v36 }
 0x10e   :  { %1417 = vrot.lane.b32.xlu0 %v407_v20, %s2018_s3  ;;  %1898 = vmatmul.mubr.msk.f32.gmra.mrb[38].mxu1 %vm75_vm0, %v466_v2 }
 0x10f   :  { %1419 = vrot.lane.b32.xlu1 %v412_v19, %s2018_s3  ;;  %1900 = vmatprep.mubr.msk.f32.mxu1 %vm75_vm0, %v467_v21 }
 0x112   :  { %1381 = vrot.lane.b32.xlu0 %v2313_v46, %s2018_s3  ;;  %1901 = vmatmul.mubr.msk.f32.gmra.mrb[40].mxu1 %vm75_vm0, %v468_v23 }
 0x113   :  { %1383 = vrot.lane.b32.xlu1 %v2310_v45, %s2018_s3  ;;  %1903 = vmatprep.mubr.msk.f32.mxu1 %vm75_vm0, %v469_v22 }
 0x116   :  { %1421 = vrot.lane.b32.xlu0 %v417_v54, %s2018_s3  ;;  %1904 = vmatmul.mubr.msk.f32.gmra.mrb[42].mxu1 %vm75_vm0, %v470_v3 }
 0x117   :  { %1423 = vrot.lane.b32.xlu1 %v422_v24, %s2018_s3  ;;  %1906 = vmatprep.mubr.msk.f32.mxu1 %vm75_vm0, %v471_v12 }
 0x11a   :  { %1385 = vrot.lane.b32.xlu0 %v2335_v58, %s2018_s3  ;;  %1907 = vmatmul.mubr.msk.f32.gmra.mrb[44].mxu1 %vm75_vm0, %v472_v29 }
 0x11b   :  { %1387 = vrot.lane.b32.xlu1 %v2332_v57, %s2018_s3  ;;  %1909 = vmatprep.mubr.msk.f32.mxu1 %vm75_vm0, %v473_v28 }
 0x11e   :  { %1425 = vrot.lane.b32.xlu0 %v427_v31, %s2018_s3  ;;  %1910 = vmatmul.mubr.msk.f32.gmra.mrb[46].mxu1 %vm75_vm0, %v474_v35 }
 0x11f   :  { %1427 = vrot.lane.b32.xlu1 %v432_v30, %s2018_s3  ;;  %1912 = vmatprep.mubr.msk.f32.mxu1 %vm75_vm0, %v475_v32 }
 0x122   :  { %1389 = vrot.lane.b32.xlu0 %v2352_v5, %s2018_s3  ;;  %1913 = vmatmul.mubr.msk.f32.gmra.mrb[48].mxu1 %vm75_vm0, %v476_v37 }
 0x123   :  { %1391 = vrot.lane.b32.xlu1 %v2349_v4, %s2018_s3  ;;  %1915 = vmatprep.mubr.msk.f32.mxu1 %vm75_vm0, %v477_v50 }
 0x126   :  { %1393 = vrot.lane.b32.xlu0 %v2371_v15, %s2018_s3  ;;  %1916 = vmatmul.mubr.msk.f32.gmra.mrb[50].mxu1 %vm75_vm0, %v478_v39 }
 0x127   :  { %1395 = vrot.lane.b32.xlu1 %v2368_v14, %s2018_s3  ;;  %1918 = vmatprep.mubr.msk.f32.mxu1 %vm75_vm0, %v479_v38 }
 0x12a   :  { %1429 = vrot.lane.b32.xlu0 %v2356_v6, %s2018_s3  ;;  %1919 = vmatmul.mubr.msk.f32.gmra.mrb[52].mxu1 %vm75_vm0, %v480_v41 }
 0x12b   :  { %1431 = vrot.lane.b32.xlu1 %v2345_v63, %s2018_s3  ;;  %1921 = vmatprep.mubr.msk.f32.mxu1 %vm75_vm0, %v481_v40 }
 0x12e   :  { %1922 = vmatmul.mubr.msk.f32.gmra.mrb[54].mxu1 %vm75_vm0, %v482_v42 }
 0x1b9   :  { %v1869_v44 = vpop.f32.mrb[18].mxu1 }
 0x1ba   :  { %v680_v45 = vadd.f32 %v1869_v44, %v2467_v43  ;;  %v674_v46 = vpop.f32.mrb[19].mxu1 }
 0x1bb   :  { %v675_v47 = vadd.f32 %v2467_v43, %v674_v46 }
 0x1bc   :  { %v864_v51 = vmax.f32 %v680_v45, 0.0 }
 0x1bd   :  { %v863_v48 = vmax.f32 %v675_v47, 0.0  ;;  %v1872_v49 = vpop.f32.mrb[20].mxu1 }
 0x1be   :  { %v690_v52 = vadd.f32 %v1872_v49, %v2467_v43  ;;  %v684_v53 = vpop.f32.mrb[21].mxu1 }
 0x1bf   :  { %v685_v55 = vadd.f32 %v2467_v43, %v684_v53  ;;  %1932 = vmatprep.mubr.msk.f32.mxu0 %vm75_vm0, %v863_v48 }
 0x1c0   :  { %1933 = vmatmul.mubr.msk.f32.vlgmr.msra.gmra.mrb[20].mxu0 %vm75_vm0, %v864_v51  ;;  %v866_v58 = vmax.f32 %v690_v52, 0.0 }
 0x1c1   :  { %v865_v56 = vmax.f32 %v685_v55, 0.0  ;;  %v1875_v57 = vpop.f32.mrb[22].mxu1 }
 0x1c2   :  { %v700_v59 = vadd.f32 %v1875_v57, %v2467_v43  ;;  %v694_v60 = vpop.f32.mrb[23].mxu1 }
 0x1c3   :  { %v695_v61 = vadd.f32 %v2467_v43, %v694_v60  ;;  %1935 = vmatprep.mubr.msk.f32.mxu0 %vm75_vm0, %v865_v56 }
 0x1c4   :  { %1936 = vmatmul.mubr.msk.f32.gmra.mrb[22].mxu0 %vm75_vm0, %v866_v58  ;;  %v868_v0 = vmax.f32 %v700_v59, 0.0 }
 0x1c5   :  { %v867_v62 = vmax.f32 %v695_v61, 0.0  ;;  %v1878_v63 = vpop.f32.mrb[24].mxu1 }
 0x1c6   :  { %v710_v1 = vadd.f32 %v1878_v63, %v2467_v43  ;;  %v704_v4 = vpop.f32.mrb[25].mxu1 }
 0x1c7   :  { %v705_v5 = vadd.f32 %v2467_v43, %v704_v4  ;;  %1938 = vmatprep.mubr.msk.f32.mxu0 %vm75_vm0, %v867_v62 }
 0x1c8   :  { %1939 = vmatmul.mubr.msk.f32.gmra.mrb[24].mxu0 %vm75_vm0, %v868_v0  ;;  %v870_v8 = vmax.f32 %v710_v1, 0.0 }
 0x1c9   :  { %v869_v6 = vmax.f32 %v705_v5, 0.0  ;;  %v1881_v7 = vpop.f32.mrb[26].mxu1 }
 0x1ca   :  { %v720_v9 = vadd.f32 %v1881_v7, %v2467_v43  ;;  %v714_v10 = vpop.f32.mrb[27].mxu1 }
 0x1cb   :  { %v715_v11 = vadd.f32 %v2467_v43, %v714_v10  ;;  %1941 = vmatprep.mubr.msk.f32.mxu0 %vm75_vm0, %v869_v6 }
 0x1cc   :  { %1942 = vmatmul.mubr.msk.f32.gmra.mrb[26].mxu0 %vm75_vm0, %v870_v8  ;;  %v872_v15 = vmax.f32 %v720_v9, 0.0 }
 0x1cd   :  { %v871_v13 = vmax.f32 %v715_v11, 0.0  ;;  %v1884_v14 = vpop.f32.mrb[28].mxu1 }
 0x1ce   :  { %v730_v16 = vadd.f32 %v1884_v14, %v2467_v43  ;;  %v724_v17 = vpop.f32.mrb[29].mxu1 }
 0x1cf   :  { %v725_v18 = vadd.f32 %v2467_v43, %v724_v17  ;;  %1944 = vmatprep.mubr.msk.f32.mxu0 %vm75_vm0, %v871_v13 }
 0x1d0   :  { %1945 = vmatmul.mubr.msk.f32.gmra.mrb[28].mxu0 %vm75_vm0, %v872_v15  ;;  %v874_v21 = vmax.f32 %v730_v16, 0.0 }
 0x1d1   :  { %v873_v19 = vmax.f32 %v725_v18, 0.0  ;;  %v1887_v20 = vpop.f32.mrb[30].mxu1 }
 0x1d2   :  { %v740_v2 = vadd.f32 %v1887_v20, %v2467_v43  ;;  %v734_v22 = vpop.f32.mrb[31].mxu1 }
 0x1d3   :  { %v735_v23 = vadd.f32 %v2467_v43, %v734_v22  ;;  %1947 = vmatprep.mubr.msk.f32.mxu0 %vm75_vm0, %v873_v19 }
 0x1d4   :  { %1948 = vmatmul.mubr.msk.f32.gmra.mrb[30].mxu0 %vm75_vm0, %v874_v21  ;;  %v876_v12 = vmax.f32 %v740_v2, 0.0 }
 0x1d5   :  { %v875_v24 = vmax.f32 %v735_v23, 0.0  ;;  %v1890_v54 = vpop.f32.mrb[32].mxu1 }
 0x1d6   :  { %v750_v3 = vadd.f32 %v1890_v54, %v2467_v43  ;;  %v744_v25 = vpop.f32.mrb[33].mxu1 }
 0x1d7   :  { %v745_v26 = vadd.f32 %v2467_v43, %v744_v25  ;;  %1950 = vmatprep.mubr.msk.f32.mxu0 %vm75_vm0, %v875_v24 }
 0x1d8   :  { %1951 = vmatmul.mubr.msk.f32.gmra.mrb[32].mxu0 %vm75_vm0, %v876_v12  ;;  %v878_v29 = vmax.f32 %v750_v3, 0.0 }
 0x1d9   :  { %v877_v27 = vmax.f32 %v745_v26, 0.0  ;;  %v1893_v28 = vpop.f32.mrb[34].mxu1 }
 0x1da   :  { %v760_v30 = vadd.f32 %v1893_v28, %v2467_v43  ;;  %v754_v31 = vpop.f32.mrb[35].mxu1 }
 0x1db   :  { %v755_v32 = vadd.f32 %v2467_v43, %v754_v31  ;;  %1953 = vmatprep.mubr.msk.f32.mxu0 %vm75_vm0, %v877_v27 }
 0x1dc   :  { %1954 = vmatmul.mubr.msk.f32.gmra.mrb[34].mxu0 %vm75_vm0, %v878_v29  ;;  %v880_v35 = vmax.f32 %v760_v30, 0.0 }
 0x1dd   :  { %v879_v33 = vmax.f32 %v755_v32, 0.0  ;;  %v1896_v34 = vpop.f32.mrb[36].mxu1  ;;  %v2545_v32 = vpop.permute.xlu1 %1399 }
 0x1de   :  { %v770_v36 = vadd.f32 %v1896_v34, %v2467_v43  ;;  %v764_v50 = vpop.f32.mrb[37].mxu1 }
 0x1df   :  { %v765_v37 = vadd.f32 %v2467_v43, %v764_v50  ;;  %1956 = vmatprep.mubr.msk.f32.mxu0 %vm75_vm0, %v879_v33  ;;  %v1360_v33 = vpop.permute.xlu0 %1359 }
 0x1e0   :  { %1957 = vmatmul.mubr.msk.f32.gmra.mrb[36].mxu0 %vm75_vm0, %v880_v35  ;;  %v882_v40 = vmax.f32 %v770_v36, 0.0 }
 0x1e1   :  { %v881_v38 = vmax.f32 %v765_v37, 0.0  ;;  %v1899_v39 = vpop.f32.mrb[38].mxu1  ;;  %v1364_v34 = vpop.permute.xlu1 %1363 }
 0x1e2   :  { %v780_v41 = vadd.f32 %v1899_v39, %v2467_v43  ;;  %v774_v42 = vpop.f32.mrb[39].mxu1 }
 0x1e3   :  { %v775_v44 = vadd.f32 %v2467_v43, %v774_v42  ;;  %1959 = vmatprep.mubr.msk.f32.mxu0 %vm75_vm0, %v881_v38  ;;  %v1358_v35 = vpop.permute.xlu0 %1357 }
 0x1e4   :  { %1960 = vmatmul.mubr.msk.f32.gmra.mrb[38].mxu0 %vm75_vm0, %v882_v40  ;;  %v884_v47 = vmax.f32 %v780_v41, 0.0 }
 0x1e5   :  { %v883_v45 = vmax.f32 %v775_v44, 0.0  ;;  %v1902_v46 = vpop.f32.mrb[40].mxu1  ;;  %v2547_v36 = vpop.permute.xlu1 %1403 }
 0x1e6   :  { %v790_v48 = vadd.f32 %v1902_v46, %v2467_v43  ;;  %v784_v49 = vpop.f32.mrb[41].mxu1 }
 0x1e7   :  { %v785_v51 = vadd.f32 %v2467_v43, %v784_v49  ;;  %1962 = vmatprep.mubr.msk.f32.mxu0 %vm75_vm0, %v883_v45  ;;  %v2549_v50 = vpop.permute.xlu0 %1397 }
 0x1e8   :  { %1963 = vmatmul.mubr.msk.f32.gmra.mrb[40].mxu0 %vm75_vm0, %v884_v47  ;;  %v886_v55 = vmax.f32 %v790_v48, 0.0 }
 0x1e9   :  { %v885_v52 = vmax.f32 %v785_v51, 0.0  ;;  %v1905_v53 = vpop.f32.mrb[42].mxu1 }
 0x1ea   :  { %v800_v56 = vadd.f32 %v1905_v53, %v2467_v43  ;;  %v794_v57 = vpop.f32.mrb[43].mxu1  ;;  %v2572_v53 = vld [vmem:[%s2803_s6] ss:$0 sm:$0xff] }
 0x1eb   :  { %v795_v58 = vadd.f32 %v2467_v43, %v794_v57  ;;  %1965 = vmatprep.mubr.msk.f32.mxu0 %vm75_vm0, %v885_v52  ;;  %v2551_v37 = vpop.permute.xlu0 %1401 }
 0x1ec   :  { %1966 = vmatmul.mubr.msk.f32.gmra.mrb[42].mxu0 %vm75_vm0, %v886_v55  ;;  %v888_v61 = vmax.f32 %v800_v56, 0.0 }
 0x1ed   :  { %v887_v59 = vmax.f32 %v795_v58, 0.0  ;;  %v1908_v60 = vpop.f32.mrb[44].mxu1 }
 0x1ee   :  { %v810_v62 = vadd.f32 %v1908_v60, %v2467_v43  ;;  %v804_v63 = vpop.f32.mrb[45].mxu1 }
 0x1ef   :  { %v805_v0 = vadd.f32 %v2467_v43, %v804_v63  ;;  %1968 = vmatprep.mubr.msk.f32.mxu0 %vm75_vm0, %v887_v59  ;;  %v1366_v39 = vpop.permute.xlu0 %1365 }
 0x1f0   :  { %1969 = vmatmul.mubr.msk.f32.gmra.mrb[44].mxu0 %vm75_vm0, %v888_v61  ;;  %v890_v5 = vmax.f32 %v810_v62, 0.0 }
 0x1f1   :  { %v889_v1 = vmax.f32 %v805_v0, 0.0  ;;  %v1911_v4 = vpop.f32.mrb[46].mxu1 }
 0x1f2   :  { %v820_v6 = vadd.f32 %v1911_v4, %v2467_v43  ;;  %v814_v7 = vpop.f32.mrb[47].mxu1 }
 0x1f3   :  { %v815_v8 = vadd.f32 %v2467_v43, %v814_v7  ;;  %1971 = vmatprep.mubr.msk.f32.mxu0 %vm75_vm0, %v889_v1  ;;  %v2555_v41 = vpop.permute.xlu0 %1405 }
 0x1f4   :  { %1972 = vmatmul.mubr.msk.f32.gmra.mrb[46].mxu0 %vm75_vm0, %v890_v5  ;;  %v892_v11 = vmax.f32 %v820_v6, 0.0 }
 0x1f5   :  { %v891_v9 = vmax.f32 %v815_v8, 0.0  ;;  %v1914_v10 = vpop.f32.mrb[48].mxu1 }
 0x1f6   :  { %v830_v13 = vadd.f32 %v1914_v10, %v2467_v43  ;;  %v824_v14 = vpop.f32.mrb[49].mxu1 }
 0x1f7   :  { %v825_v15 = vadd.f32 %v2467_v43, %v824_v14  ;;  %1974 = vmatprep.mubr.msk.f32.mxu0 %vm75_vm0, %v891_v9  ;;  %v1370_v44 = vpop.permute.xlu0 %1369 }
 0x1f8   :  { %1975 = vmatmul.mubr.msk.f32.gmra.mrb[48].mxu0 %vm75_vm0, %v892_v11  ;;  %v894_v18 = vmax.f32 %v830_v13, 0.0 }
 0x1f9   :  { %v893_v16 = vmax.f32 %v825_v15, 0.0  ;;  %v1917_v17 = vpop.f32.mrb[50].mxu1 }
 0x1fa   :  { %v840_v19 = vadd.f32 %v1917_v17, %v2467_v43  ;;  %v834_v20 = vpop.f32.mrb[51].mxu1 }
 0x1fb   :  { %v835_v21 = vadd.f32 %v2467_v43, %v834_v20  ;;  %1977 = vmatprep.mubr.msk.f32.mxu0 %vm75_vm0, %v893_v16  ;;  %v2559_v46 = vpop.permute.xlu0 %1409 }
 0x1fc   :  { %1978 = vmatmul.mubr.msk.f32.gmra.mrb[50].mxu0 %vm75_vm0, %v894_v18  ;;  %v896_v23 = vmax.f32 %v840_v19, 0.0 }
 0x1fd   :  { %v895_v2 = vmax.f32 %v835_v21, 0.0  ;;  %v1920_v22 = vpop.f32.mrb[52].mxu1 }
 0x1fe   :  { %v850_v24 = vadd.f32 %v1920_v22, %v2467_v43  ;;  %v844_v54 = vpop.f32.mrb[53].mxu1 }
 0x1ff   :  { %v845_v12 = vadd.f32 %v2467_v43, %v844_v54  ;;  %1980 = vmatprep.mubr.msk.f32.mxu0 %vm75_vm0, %v895_v2  ;;  %v2561_v48 = vpop.permute.xlu0 %1373 }
 0x200   :  { %1981 = vmatmul.mubr.msk.f32.gmra.mrb[52].mxu0 %vm75_vm0, %v896_v23  ;;  %v898_v26 = vmax.f32 %v850_v24, 0.0 }
 0x201   :  { %v897_v3 = vmax.f32 %v845_v12, 0.0  ;;  %v1923_v25 = vpop.f32.mrb[54].mxu1 }
 0x202   :  { %v860_v27 = vadd.f32 %v1923_v25, %v2467_v43  ;;  %v854_v28 = vpop.f32.mrb[55].mxu1 }
 0x203   :  { %v855_v29 = vadd.f32 %v2467_v43, %v854_v28  ;;  %1983 = vmatprep.mubr.msk.f32.mxu0 %vm75_vm0, %v897_v3  ;;  %v1362_v43 = vpop.permute.xlu1 %1361  ;;  %v2565_v51 = vpop.permute.xlu0 %1413 }
 0x204   :  { %1984 = vmatmul.mubr.msk.f32.gmra.mrb[54].mxu0 %vm75_vm0, %v898_v26  ;;  %v900_v31 = vmax.f32 %v860_v27, 0.0 }
 0x205   :  { %v899_v30 = vmax.f32 %v855_v29, 0.0 }
 0x207   :  { %1986 = vmatprep.mubr.msk.f32.mxu0 %vm75_vm0, %v899_v30  ;;  %v1368_v38 = vpop.permute.xlu1 %1367  ;;  %v2574_v55 = vpop.permute.xlu0 %1377 }
 0x208   :  { %1987 = vmatmul.mubr.msk.f32.gmra.mrb[56].mxu0 %vm75_vm0, %v900_v31 }
 0x20b   :  { %v2553_v40 = vpop.permute.xlu1 %1407  ;;  %v2580_v0 = vpop.permute.xlu0 %1417 }
 0x20f   :  { %v1372_v42 = vpop.permute.xlu1 %1371  ;;  %v1382_v18 = vpop.permute.xlu0 %1381 }
 0x213   :  { %v2557_v45 = vpop.permute.xlu1 %1411  ;;  %v2614_v27 = vpop.permute.xlu0 %1421 }
 0x217   :  { %v1376_v47 = vpop.permute.xlu1 %1375 }
 0x21b   :  { %v2563_v49 = vpop.permute.xlu1 %1415 }
 0x21f   :  { %v2567_v52 = vpop.permute.xlu1 %1379 }
 0x223   :  { %v2578_v61 = vpop.permute.xlu1 %1419 }
 0x227   :  { %v1384_v15 = vpop.permute.xlu1 %1383 }
 0x22b   :  { %v2608_v3 = vpop.permute.xlu1 %1423 }
 0x293   :  { %v1934_v56 = vpop.f32.mrb[20].mxu0 }
 0x294   :  { %v1098_v57 = vadd.f32 %v1934_v56, %v2572_v53  ;;  %v1092_v58 = vpop.f32.mrb[21].mxu0 }
 0x295   :  { %v1093_v59 = vadd.f32 %v2572_v53, %v1092_v58  ;;  %v1386_v58 = vpop.permute.xlu0 %1385 }
 0x296   :  { %v1282_v60 = vmax.f32 %v1098_v57, 0.0 }
 0x297   :  { %v1281_v62 = vmax.f32 %v1093_v59, 0.0  ;;  %v1937_v63 = vpop.f32.mrb[22].mxu0 }
 0x298   :  { %v1472_v1 = vadd.f32 %v1360_v33, %v1282_v60  ;;  %v1108_v4 = vadd.f32 %v1937_v63, %v2572_v53  ;;  %v1102_v5 = vpop.f32.mrb[23].mxu0 }
 0x299   :  { %v1471_v6 = vadd.f32 %v1358_v35, %v1281_v62  ;;  %v1103_v7 = vadd.f32 %v2572_v53, %v1102_v5 }
 0x29a   :  { %1510 = vst.msk [vmem:[%s2804_s7 + $0x8] sm:$0xff] %vm75_vm0, %v1472_v1  ;;  %v1284_v8 = vmax.f32 %v1108_v4, 0.0 }
 0x29b   :  { %1509 = vst.msk [vmem:[%s2804_s7] sm:$0xff] %vm75_vm0, %v1471_v6  ;;  %v1283_v9 = vmax.f32 %v1103_v7, 0.0  ;;  %v1940_v10 = vpop.f32.mrb[24].mxu0 }
 0x29c   :  { %v1474_v11 = vadd.f32 %v1364_v34, %v1284_v8  ;;  %v1118_v13 = vadd.f32 %v1940_v10, %v2572_v53  ;;  %v1112_v14 = vpop.f32.mrb[25].mxu0  ;;  %v2651_v8 = vpop.permute.xlu0 %1425 }
 0x29d   :  { %v1473_v16 = vadd.f32 %v1362_v43, %v1283_v9  ;;  %v1113_v17 = vadd.f32 %v2572_v53, %v1112_v14 }
 0x29e   :  { %1512 = vst.msk [vmem:[%s2804_s7 + $0x18] sm:$0xff] %vm75_vm0, %v1474_v11  ;;  %v1286_v19 = vmax.f32 %v1118_v13, 0.0 }
 0x29f   :  { %1511 = vst.msk [vmem:[%s2804_s7 + $0x10] sm:$0xff] %vm75_vm0, %v1473_v16  ;;  %v1285_v20 = vmax.f32 %v1113_v17, 0.0  ;;  %v1943_v21 = vpop.f32.mrb[26].mxu0 }
 0x2a0   :  { %v1476_v2 = vadd.f32 %v1368_v38, %v1286_v19  ;;  %v1128_v22 = vadd.f32 %v1943_v21, %v2572_v53  ;;  %v1122_v23 = vpop.f32.mrb[27].mxu0 }
 0x2a1   :  { %v1475_v24 = vadd.f32 %v1366_v39, %v1285_v20  ;;  %v1123_v54 = vadd.f32 %v2572_v53, %v1122_v23 }
 0x2a2   :  { %1514 = vst.msk [vmem:[%s2804_s7 + $0x28] sm:$0xff] %vm75_vm0, %v1476_v2  ;;  %v1288_v12 = vmax.f32 %v1128_v22, 0.0  ;;  %v1390_v22 = vpop.permute.xlu0 %1389 }
 0x2a3   :  { %1513 = vst.msk [vmem:[%s2804_s7 + $0x20] sm:$0xff] %vm75_vm0, %v1475_v24  ;;  %v1287_v25 = vmax.f32 %v1123_v54, 0.0  ;;  %v1946_v26 = vpop.f32.mrb[28].mxu0 }
 0x2a4   :  { %v1478_v28 = vadd.f32 %v1372_v42, %v1288_v12  ;;  %v1138_v29 = vadd.f32 %v1946_v26, %v2572_v53  ;;  %v1132_v30 = vpop.f32.mrb[29].mxu0 }
 0x2a5   :  { %v1477_v31 = vadd.f32 %v1370_v44, %v1287_v25  ;;  %v1133_v33 = vadd.f32 %v2572_v53, %v1132_v30  ;;  %v1388_v44 = vpop.permute.xlu1 %1387 }
 0x2a6   :  { %1516 = vst.msk [vmem:[%s2804_s7 + $0x38] sm:$0xff] %vm75_vm0, %v1478_v28  ;;  %v1290_v34 = vmax.f32 %v1138_v29, 0.0 }
 0x2a7   :  { %1515 = vst.msk [vmem:[%s2804_s7 + $0x30] sm:$0xff] %vm75_vm0, %v1477_v31  ;;  %v1289_v35 = vmax.f32 %v1133_v33, 0.0  ;;  %v1949_v43 = vpop.f32.mrb[30].mxu0 }
 0x2a8   :  { %v1480_v38 = vadd.f32 %v1376_v47, %v1290_v34  ;;  %v1148_v39 = vadd.f32 %v1949_v43, %v2572_v53  ;;  %v1142_v42 = vpop.f32.mrb[31].mxu0 }
 0x2a9   :  { %v1479_v56 = vadd.f32 %v2561_v48, %v1289_v35  ;;  %v1143_v57 = vadd.f32 %v2572_v53, %v1142_v42  ;;  %v2645_v6 = vpop.permute.xlu1 %1427  ;;  %v1394_v35 = vpop.permute.xlu0 %1393 }
 0x2aa   :  { %1518 = vst.msk [vmem:[%s2804_s7 + $0x48] sm:$0xff] %vm75_vm0, %v1480_v38  ;;  %v1292_v59 = vmax.f32 %v1148_v39, 0.0 }
 0x2ab   :  { %1517 = vst.msk [vmem:[%s2804_s7 + $0x40] sm:$0xff] %vm75_vm0, %v1479_v56  ;;  %v1291_v47 = vmax.f32 %v1143_v57, 0.0  ;;  %v1952_v60 = vpop.f32.mrb[32].mxu0 }
 0x2ac   :  { %v1482_v62 = vadd.f32 %v2567_v52, %v1292_v59  ;;  %v1158_v48 = vadd.f32 %v1952_v60, %v2572_v53  ;;  %v1152_v63 = vpop.f32.mrb[33].mxu0 }
 0x2ad   :  { %v1481_v1 = vadd.f32 %v2574_v55, %v1291_v47  ;;  %v1153_v4 = vadd.f32 %v2572_v53, %v1152_v63 }
 0x2ae   :  { %1520 = vst.msk [vmem:[%s2804_s7 + $0x58] sm:$0xff] %vm75_vm0, %v1482_v62  ;;  %v1294_v5 = vmax.f32 %v1158_v48, 0.0 }
 0x2af   :  { %1519 = vst.msk [vmem:[%s2804_s7 + $0x50] sm:$0xff] %vm75_vm0, %v1481_v1  ;;  %v1293_v52 = vmax.f32 %v1153_v4, 0.0  ;;  %v1955_v7 = vpop.f32.mrb[34].mxu0 }
 0x2b0   :  { %v1484_v55 = vadd.f32 %v1384_v15, %v1294_v5  ;;  %v1168_v9 = vadd.f32 %v1955_v7, %v2572_v53  ;;  %v1162_v10 = vpop.f32.mrb[35].mxu0 }
 0x2b1   :  { %v1483_v11 = vadd.f32 %v1382_v18, %v1293_v52  ;;  %v1163_v13 = vadd.f32 %v2572_v53, %v1162_v10  ;;  %v1392_v18 = vpop.permute.xlu1 %1391 }
 0x2b2   :  { %1522 = vst.msk [vmem:[%s2804_s7 + $0x68] sm:$0xff] %vm75_vm0, %v1484_v55  ;;  %v1296_v14 = vmax.f32 %v1168_v9, 0.0 }
 0x2b3   :  { %1521 = vst.msk [vmem:[%s2804_s7 + $0x60] sm:$0xff] %vm75_vm0, %v1483_v11  ;;  %v1295_v16 = vmax.f32 %v1163_v13, 0.0  ;;  %v1958_v17 = vpop.f32.mrb[36].mxu0 }
 0x2b4   :  { %v1486_v15 = vadd.f32 %v1388_v44, %v1296_v14  ;;  %v1178_v19 = vadd.f32 %v1958_v17, %v2572_v53  ;;  %v1172_v20 = vpop.f32.mrb[37].mxu0 }
 0x2b5   :  { %v1485_v21 = vadd.f32 %v1386_v58, %v1295_v16  ;;  %v1173_v2 = vadd.f32 %v2572_v53, %v1172_v20  ;;  %v1396_v31 = vpop.permute.xlu1 %1395 }
 0x2b6   :  { %1524 = vst.msk [vmem:[%s2804_s7 + $0x78] sm:$0xff] %vm75_vm0, %v1486_v15  ;;  %v1298_v23 = vmax.f32 %v1178_v19, 0.0 }
 0x2b7   :  { %1523 = vst.msk [vmem:[%s2804_s7 + $0x70] sm:$0xff] %vm75_vm0, %v1485_v21  ;;  %v1297_v24 = vmax.f32 %v1173_v2, 0.0  ;;  %v1961_v54 = vpop.f32.mrb[38].mxu0 }
 0x2b8   :  { %v1488_v12 = vadd.f32 %v1392_v18, %v1298_v23  ;;  %v1188_v25 = vadd.f32 %v1961_v54, %v2572_v53  ;;  %v1182_v26 = vpop.f32.mrb[39].mxu0 }
 0x2b9   :  { %v1487_v28 = vadd.f32 %v1390_v22, %v1297_v24  ;;  %v1183_v29 = vadd.f32 %v2572_v53, %v1182_v26 }
 0x2ba   :  { %1526 = vst.msk [vmem:[%s2804_s7 + $0x88] sm:$0xff] %vm75_vm0, %v1488_v12  ;;  %v1300_v30 = vmax.f32 %v1188_v25, 0.0 }
 0x2bb   :  { %1525 = vst.msk [vmem:[%s2804_s7 + $0x80] sm:$0xff] %vm75_vm0, %v1487_v28  ;;  %v1299_v33 = vmax.f32 %v1183_v29, 0.0  ;;  %v1964_v34 = vpop.f32.mrb[40].mxu0 }
 0x2bc   :  { %v1490_v43 = vadd.f32 %v1396_v31, %v1300_v30  ;;  %v1198_v38 = vadd.f32 %v1964_v34, %v2572_v53  ;;  %v1192_v39 = vpop.f32.mrb[41].mxu0 }
 0x2bd   :  { %v1489_v42 = vadd.f32 %v1394_v35, %v1299_v33  ;;  %v1193_v44 = vadd.f32 %v2572_v53, %v1192_v39 }
 0x2be   :  { %1528 = vst.msk [vmem:[%s2804_s7 + $0x98] sm:$0xff] %vm75_vm0, %v1490_v43  ;;  %v1302_v56 = vmax.f32 %v1198_v38, 0.0 }
 0x2bf   :  { %1527 = vst.msk [vmem:[%s2804_s7 + $0x90] sm:$0xff] %vm75_vm0, %v1489_v42  ;;  %v1301_v57 = vmax.f32 %v1193_v44, 0.0  ;;  %v1967_v58 = vpop.f32.mrb[42].mxu0 }
 0x2c0   :  { %v1492_v59 = vadd.f32 %v2545_v32, %v1302_v56  ;;  %v1208_v47 = vadd.f32 %v1967_v58, %v2572_v53  ;;  %v1202_v60 = vpop.f32.mrb[43].mxu0 }
 0x2c1   :  { %v1491_v62 = vadd.f32 %v2549_v50, %v1301_v57  ;;  %v1203_v48 = vadd.f32 %v2572_v53, %v1202_v60  ;;  %v1430_v60 = vpop.permute.xlu0 %1429 }
 0x2c2   :  { %1530 = vst.msk [vmem:[%s2804_s7 + $0xa8] sm:$0xff] %vm75_vm0, %v1492_v59  ;;  %v1304_v63 = vmax.f32 %v1208_v47, 0.0  ;;  %v1432_v47 = vpop.permute.xlu1 %1431 }
 0x2c3   :  { %1529 = vst.msk [vmem:[%s2804_s7 + $0xa0] sm:$0xff] %vm75_vm0, %v1491_v62  ;;  %v1303_v1 = vmax.f32 %v1203_v48, 0.0  ;;  %v1970_v32 = vpop.f32.mrb[44].mxu0 }
 0x2c4   :  { %v1494_v4 = vadd.f32 %v2547_v36, %v1304_v63  ;;  %v1218_v5 = vadd.f32 %v1970_v32, %v2572_v53  ;;  %v1212_v50 = vpop.f32.mrb[45].mxu0 }
 0x2c5   :  { %v1493_v52 = vadd.f32 %v2551_v37, %v1303_v1  ;;  %v1213_v7 = vadd.f32 %v2572_v53, %v1212_v50 }
 0x2c6   :  { %1532 = vst.msk [vmem:[%s2804_s7 + $0xb8] sm:$0xff] %vm75_vm0, %v1494_v4  ;;  %v1306_v55 = vmax.f32 %v1218_v5, 0.0 }
 0x2c7   :  { %1531 = vst.msk [vmem:[%s2804_s7 + $0xb0] sm:$0xff] %vm75_vm0, %v1493_v52  ;;  %v1305_v9 = vmax.f32 %v1213_v7, 0.0  ;;  %v1973_v36 = vpop.f32.mrb[46].mxu0 }
 0x2c8   :  { %v1496_v10 = vadd.f32 %v2553_v40, %v1306_v55  ;;  %v1228_v11 = vadd.f32 %v1973_v36, %v2572_v53  ;;  %v1222_v37 = vpop.f32.mrb[47].mxu0 }
 0x2c9   :  { %v1495_v13 = vadd.f32 %v2555_v41, %v1305_v9  ;;  %v1223_v14 = vadd.f32 %v2572_v53, %v1222_v37 }
 0x2ca   :  { %1534 = vst.msk [vmem:[%s2804_s7 + $0xc8] sm:$0xff] %vm75_vm0, %v1496_v10  ;;  %v1308_v16 = vmax.f32 %v1228_v11, 0.0 }
 0x2cb   :  { %1533 = vst.msk [vmem:[%s2804_s7 + $0xc0] sm:$0xff] %vm75_vm0, %v1495_v13  ;;  %v1307_v17 = vmax.f32 %v1223_v14, 0.0  ;;  %v1976_v40 = vpop.f32.mrb[48].mxu0 }
 0x2cc   :  { %v1498_v15 = vadd.f32 %v2557_v45, %v1308_v16  ;;  %v1238_v19 = vadd.f32 %v1976_v40, %v2572_v53  ;;  %v1232_v41 = vpop.f32.mrb[49].mxu0 }
 0x2cd   :  { %v1497_v20 = vadd.f32 %v2559_v46, %v1307_v17  ;;  %v1233_v18 = vadd.f32 %v2572_v53, %v1232_v41 }
 0x2ce   :  { %1536 = vst.msk [vmem:[%s2804_s7 + $0xd8] sm:$0xff] %vm75_vm0, %v1498_v15  ;;  %v1310_v21 = vmax.f32 %v1238_v19, 0.0 }
 0x2cf   :  { %1535 = vst.msk [vmem:[%s2804_s7 + $0xd0] sm:$0xff] %vm75_vm0, %v1497_v20  ;;  %v1309_v2 = vmax.f32 %v1233_v18, 0.0  ;;  %v1979_v45 = vpop.f32.mrb[50].mxu0 }
 0x2d0   :  { %v1500_v22 = vadd.f32 %v2563_v49, %v1310_v21  ;;  %v1248_v23 = vadd.f32 %v1979_v45, %v2572_v53  ;;  %v1242_v46 = vpop.f32.mrb[51].mxu0 }
 0x2d1   :  { %v1499_v24 = vadd.f32 %v2565_v51, %v1309_v2  ;;  %v1243_v54 = vadd.f32 %v2572_v53, %v1242_v46 }
 0x2d2   :  { %1538 = vst.msk [vmem:[%s2804_s7 + $0xe8] sm:$0xff] %vm75_vm0, %v1500_v22  ;;  %v1312_v12 = vmax.f32 %v1248_v23, 0.0 }
 0x2d3   :  { %1537 = vst.msk [vmem:[%s2804_s7 + $0xe0] sm:$0xff] %vm75_vm0, %v1499_v24  ;;  %v1311_v25 = vmax.f32 %v1243_v54, 0.0  ;;  %v1982_v49 = vpop.f32.mrb[52].mxu0 }
 0x2d4   :  { %v1502_v26 = vadd.f32 %v2578_v61, %v1312_v12  ;;  %v1258_v28 = vadd.f32 %v1982_v49, %v2572_v53  ;;  %v1252_v51 = vpop.f32.mrb[53].mxu0 }
 0x2d5   :  { %v1501_v29 = vadd.f32 %v2580_v0, %v1311_v25  ;;  %v1253_v30 = vadd.f32 %v2572_v53, %v1252_v51 }
 0x2d6   :  { %1540 = vst.msk [vmem:[%s2804_s7 + $0xf8] sm:$0xff] %vm75_vm0, %v1502_v26  ;;  %v1314_v31 = vmax.f32 %v1258_v28, 0.0 }
 0x2d7   :  { %1539 = vst.msk [vmem:[%s2804_s7 + $0xf0] sm:$0xff] %vm75_vm0, %v1501_v29  ;;  %v1313_v33 = vmax.f32 %v1253_v30, 0.0  ;;  %v1985_v61 = vpop.f32.mrb[54].mxu0 }
 0x2d8   :  { %v1504_v34 = vadd.f32 %v2608_v3, %v1314_v31  ;;  %v1268_v35 = vadd.f32 %v1985_v61, %v2572_v53  ;;  %v1262_v0 = vpop.f32.mrb[55].mxu0 }
 0x2d9   :  { %v1503_v43 = vadd.f32 %v2614_v27, %v1313_v33  ;;  %v1263_v38 = vadd.f32 %v2572_v53, %v1262_v0 }
 0x2da   :  { %1542 = vst.msk [vmem:[%s2804_s7 + $0x108] sm:$0xff] %vm75_vm0, %v1504_v34  ;;  %v1316_v39 = vmax.f32 %v1268_v35, 0.0 }
 0x2db   :  { %1541 = vst.msk [vmem:[%s2804_s7 + $0x100] sm:$0xff] %vm75_vm0, %v1503_v43  ;;  %v1315_v42 = vmax.f32 %v1263_v38, 0.0  ;;  %v1988_v3 = vpop.f32.mrb[56].mxu0 }
 0x2dc   :  { %v1506_v44 = vadd.f32 %v2645_v6, %v1316_v39  ;;  %v1278_v56 = vadd.f32 %v1988_v3, %v2572_v53  ;;  %v1272_v27 = vpop.f32.mrb[57].mxu0 }
 0x2dd   :  { %v1505_v57 = vadd.f32 %v2651_v8, %v1315_v42  ;;  %v1273_v58 = vadd.f32 %v2572_v53, %v1272_v27 }
 0x2de   :  { %1544 = vst.msk [vmem:[%s2804_s7 + $0x118] sm:$0xff] %vm75_vm0, %v1506_v44  ;;  %v1318_v59 = vmax.f32 %v1278_v56, 0.0 }
 0x2df   :  { %1543 = vst.msk [vmem:[%s2804_s7 + $0x110] sm:$0xff] %vm75_vm0, %v1505_v57  ;;  %v1317_v6 = vmax.f32 %v1273_v58, 0.0 }
 0x2e0   :  { %v1508_v62 = vadd.f32 %v1432_v47, %v1318_v59 }
 0x2e1   :  { %v1507_v48 = vadd.f32 %v1430_v60, %v1317_v6 }
 0x2e2   :  { %1546 = vst.msk [vmem:[%s2804_s7 + $0x128] sm:$0xff] %vm75_vm0, %v1508_v62 }
 0x2e3   :  { %1545 = vst.msk [vmem:[%s2804_s7 + $0x120] sm:$0xff] %vm75_vm0, %v1507_v48 }

</bundles_post_ra>
